<compile_context>
chip_gen: v7x
topology: tpu7x:2x2x1
jax: 0.10.0
libtpu: 0.0.40
codegen_flags: <defaults>
</compile_context>

<pallas_src>
import functools
import math

import jax
import jax.numpy as jnp
from jax.experimental import pallas as pl
from jax.experimental.pallas import tpu as pltpu

NEG_BIG = -1e30  # large finite negative; avoids -inf -> NaN on fully-masked rows


# --------------------------------------------------------------------------
# Lane-dense linear kernel: y = x @ W^T + b   (used for Q/K/V and final proj)
# --------------------------------------------------------------------------
def _linear_kernel(x_ref, wT_ref, b_ref, o_ref):
    y = jnp.dot(x_ref[...], wT_ref[...], preferred_element_type=jnp.float32)
    o_ref[...] = (y + b_ref[...]).astype(o_ref.dtype)


def _linear(x2, wT, b_row, out_dtype, row_tile):
    rows, d_in = x2.shape
    d_out = wT.shape[1]
    return pl.pallas_call(
        _linear_kernel,
        out_shape=jax.ShapeDtypeStruct((rows, d_out), out_dtype),
        grid_spec=pltpu.PrefetchScalarGridSpec(
            num_scalar_prefetch=0,
            grid=(rows // row_tile,),
            in_specs=[
                pl.BlockSpec((row_tile, d_in), lambda i: (i, 0)),
                pl.BlockSpec((d_in, d_out), lambda i: (0, 0)),
                pl.BlockSpec((1, d_out), lambda i: (0, 0)),
            ],
            out_specs=pl.BlockSpec((row_tile, d_out), lambda i: (i, 0)),
        ),
        compiler_params=pltpu.CompilerParams(dimension_semantics=("parallel",)),
    )(x2, wT, b_row)


# --------------------------------------------------------------------------
# Flash-attention kernel on pre-projected, head-split, pre-scaled Q/K/V.
# Grid = (batch, q_tiles, kv_tiles); kv axis is the online-softmax reduction.
# --------------------------------------------------------------------------
def _flash_attn_kernel(flags_ref, q_ref, k_ref, v_ref, mask_ref,
                       o_ref, m_ref, l_ref, acc_ref):
    b = pl.program_id(0)
    qi = pl.program_id(1)
    ki = pl.program_id(2)
    nq = pl.num_programs(1)
    nk = pl.num_programs(2)

    # ---- init per (batch, q-tile): reset online-softmax state.
    @pl.when(ki == 0)
    def _init():
        m_ref[...] = jnp.full(m_ref.shape, NEG_BIG, jnp.float32)
        l_ref[...] = jnp.zeros(l_ref.shape, jnp.float32)
        acc_ref[...] = jnp.zeros(acc_ref.shape, jnp.float32)

    # Scalar-prefetched block-occupancy flag (1 == kv tile fully masked).
    fully_masked = flags_ref[(b * nq + qi) * nk + ki]

    @pl.when(fully_masked == 0)
    def _update():
        q = q_ref[0]                          # (H, tq, hd) bf16, pre-scaled by 1/sqrt(hd)
        k = k_ref[0]                          # (H, tk, hd) bf16
        v = v_ref[0]                          # (H, tk, hd) bf16

        # scores for all heads at once: (H, tq, hd) x (H, tk, hd) -> (H, tq, tk)
        s = jax.lax.dot_general(q, k, (((2,), (2,)), ((0,), (0,))),
                                preferred_element_type=jnp.float32)
        bias = jnp.where(mask_ref[0] != 0, jnp.float32(NEG_BIG), jnp.float32(0.0))
        s = s + bias[None, :, :]

        # online softmax update (keep all statistics in f32).
        m_prev = m_ref[...]                                            # (H, tq, 1)
        m_new = jnp.maximum(m_prev, jnp.max(s, axis=-1, keepdims=True))
        alpha = jnp.exp(m_prev - m_new)
        p = jnp.exp(s - m_new)                                         # (H, tq, tk)
        l_ref[...] = alpha * l_ref[...] + jnp.sum(p, axis=-1, keepdims=True)
        pv = jax.lax.dot_general(p.astype(jnp.bfloat16), v,
                                 (((2,), (1,)), ((0,), (0,))),
                                 preferred_element_type=jnp.float32)   # (H, tq, hd)
        acc_ref[...] = alpha * acc_ref[...] + pv
        m_ref[...] = m_new

    # ---- finalize: normalize; final projection is done by the linear kernel.
    @pl.when(ki == nk - 1)
    def _finalize():
        inv_l = pl.reciprocal(l_ref[...], approx=True)                 # (H, tq, 1)
        o_ref[0] = (acc_ref[...] * inv_l).astype(o_ref.dtype)


# --------------------------------------------------------------------------
# Tile / VMEM heuristics
# --------------------------------------------------------------------------
def _vmem_capacity_bytes():
    try:
        return int(pltpu.get_tpu_info().vmem_capacity_bytes)
    except Exception:
        return None


def _auto_tiles(seq_len, batch):
    """Tile sizes satisfying the (8, 128) block constraints.

    The mask block's last dim is the kv tile (multiple of 128 or full seq);
    kv tile is capped lower on 64 MiB-VMEM parts (v7x); the q tile is capped
    when batch == 1 so both v7x TensorCores receive parallel work.
    """
    cap = _vmem_capacity_bytes()
    kv_cap = 512 if (cap is None or cap >= (96 << 20)) else 256

    if seq_len % 128 != 0:
        kv_tile = seq_len
    else:
        kv_tile = 128
        for t in (512, 256, 128):
            if t <= kv_cap and seq_len % t == 0:
                kv_tile = t
                break

    q_cap = 256
    if batch == 1 and seq_len >= 16:
        q_cap = min(q_cap, seq_len // 2)
    if seq_len % 8 != 0:
        q_tile = seq_len
    else:
        q_tile = 8
        for t in (256, 128, 64, 32, 16, 8):
            if t <= q_cap and seq_len % t == 0:
                q_tile = t
                break
    return q_tile, kv_tile


def _row_tile(rows):
    for t in (512, 256, 128, 64, 32, 16, 8):
        if rows % t == 0:
            return t
    return rows


def _vmem_limit_bytes():
    cap = _vmem_capacity_bytes()
    if cap is None or cap < (32 << 20):
        return None
    # ~25% headroom for the compiler; never exceed what 128 MiB parts allow.
    return min(cap * 3 // 4, 112 * 1024 * 1024)


# --------------------------------------------------------------------------
# Public wrapper
# --------------------------------------------------------------------------
def multi_head_attention(querys, keys, values, mask, wq, bq, wo, bo, num_heads,
                         *, q_tile=None, kv_tile=None):
    """Forward pass of the PyTorch MultiHeadAttention module (Pallas TPU)."""
    B, S, D = querys.shape
    assert D % num_heads == 0
    head_dim = D // num_heads
    out_dtype = querys.dtype
    scale = 1.0 / math.sqrt(head_dim)

    auto_q, auto_kv = _auto_tiles(S, B)
    tq = q_tile if q_tile is not None else auto_q
    tk = kv_tile if kv_tile is not None else auto_kv
    assert S % tq == 0 and S % tk == 0, "tile sizes must divide the sequence length"
    nq, nk = S // tq, S // tk

    # ---- wrapper-side layout plumbing (bf16 everywhere the MXU is involved).
    wqT = wq.T.astype(jnp.bfloat16)                                   # (D, D)
    bq_row = bq.reshape(1, D).astype(jnp.float32)
    wqT_scaled = (wq.T * scale).astype(jnp.bfloat16)                  # scale folded into Q proj
    bq_row_scaled = (bq * scale).reshape(1, D).astype(jnp.float32)
    woT = wo.T.astype(jnp.bfloat16)
    bo_row = bo.reshape(1, D).astype(jnp.float32)

    # ---- 1) project Q/K/V once (hoisted out of the flash loop), bf16 inputs.
    row_tile = _row_tile(B * S)
    x_q = querys.astype(jnp.bfloat16).reshape(B * S, D)
    x_k = keys.astype(jnp.bfloat16).reshape(B * S, D)
    x_v = values.astype(jnp.bfloat16).reshape(B * S, D)
    q_proj = _linear(x_q, wqT_scaled, bq_row_scaled, jnp.bfloat16, row_tile)
    k_proj = _linear(x_k, wqT, bq_row, jnp.bfloat16, row_tile)
    v_proj = _linear(x_v, wqT, bq_row, jnp.bfloat16, row_tile)

    def split_heads(x):  # (B*S, D) -> (B, H, S, hd)  (layout plumbing in XLA)
        return x.reshape(B, S, num_heads, head_dim).transpose(0, 2, 1, 3)

    qh, kh, vh = split_heads(q_proj), split_heads(k_proj), split_heads(v_proj)

    # ---- 2) mask: int8 stream + per-block "fully masked" skip flags (SMEM).
    mask_nz = (mask != 0)
    mask_i8 = mask_nz.astype(jnp.int8)
    block_fully_masked = mask_nz.reshape(B, nq, tq, nk, tk).all(axis=(2, 4))
    flags = block_fully_masked.astype(jnp.int32).reshape(-1)          # (B*nq*nk,)

    compiler_kwargs = dict(dimension_semantics=("parallel", "parallel", "arbitrary"))
    vmem_limit = _vmem_limit_bytes()
    if vmem_limit is not None:
        compiler_kwargs["vmem_limit_bytes"] = vmem_limit

    o_heads = pl.pallas_call(
        _flash_attn_kernel,
        out_shape=jax.ShapeDtypeStruct((B, num_heads, S, head_dim), jnp.bfloat16),
        grid_spec=pltpu.PrefetchScalarGridSpec(
            num_scalar_prefetch=1,
            grid=(B, nq, nk),
            in_specs=[
                pl.BlockSpec((1, num_heads, tq, head_dim),
                             lambda b, qi, ki, flags: (b, 0, qi, 0)),          # Q (scaled)
                pl.BlockSpec((1, num_heads, tk, head_dim),
                             lambda b, qi, ki, flags: (b, 0, ki, 0)),          # K
                pl.BlockSpec((1, num_heads, tk, head_dim),
                             lambda b, qi, ki, flags: (b, 0, ki, 0)),          # V
                pl.BlockSpec((1, tq, tk),
                             lambda b, qi, ki, flags: (b, qi, ki)),            # mask (int8)
            ],
            out_specs=pl.BlockSpec((1, num_heads, tq, head_dim),
                                   lambda b, qi, ki, flags: (b, 0, qi, 0)),
            scratch_shapes=[
                pltpu.VMEM((num_heads, tq, 1), jnp.float32),          # m (running max)
                pltpu.VMEM((num_heads, tq, 1), jnp.float32),          # l (running denom)
                pltpu.VMEM((num_heads, tq, head_dim), jnp.float32),   # acc (running numer)
            ],
        ),
        compiler_params=pltpu.CompilerParams(**compiler_kwargs),
    )(flags, qh, kh, vh, mask_i8)

    # ---- 3) concat heads (layout plumbing) + lane-dense final projection.
    o_cat = o_heads.transpose(0, 2, 1, 3).reshape(B * S, D)
    out = _linear(o_cat, woT, bo_row, out_dtype, row_tile)
    return out.reshape(B, S, D)


# --------------------------------------------------------------------------
# Validation
# --------------------------------------------------------------------------
def _reference(querys, keys, values, mask, wq, bq, wo, bo, num_heads):
    """Plain-JAX f32 reference mirroring the PyTorch forward."""
    B, S, D = querys.shape
    hd = D // num_heads

    def lin(x, w, b):
        return x @ w.T + b

    def split(x):  # (B,S,D) -> (B,H,S,hd)
        return x.reshape(B, S, num_heads, hd).transpose(0, 2, 1, 3)

    Q = split(lin(querys, wq, bq))
    K = split(lin(keys, wq, bq))       # q_transform shared, as in the torch forward
    V = split(lin(values, wq, bq))
    e = jnp.einsum("bhqd,bhkd->bhqk", Q, K) / math.sqrt(hd)
    e = jnp.where(mask[:, None, :, :] != 0, -jnp.inf, e)
    a = jax.nn.softmax(e, axis=-1)
    o = jnp.einsum("bhqk,bhkd->bhqd", a, V)
    o = o.transpose(0, 2, 1, 3).reshape(B, S, D)
    return o @ wo.T + bo


if __name__ == "__main__":
    def run_case(B, S, D, H, q_tile=None, kv_tile=None):
        key = jax.random.PRNGKey(0)
        k_q, k_k, k_v, k_wq, k_bq, k_wo, k_bo = jax.random.split(key, 7)
        querys = jax.random.normal(k_q, (B, S, D), jnp.float32)
        keys = jax.random.normal(k_k, (B, S, D), jnp.float32)
        values = jax.random.normal(k_v, (B, S, D), jnp.float32)

        # Strictly-causal mask (nonzero == masked); no fully-masked rows.
        causal = jnp.triu(jnp.ones((S, S), jnp.float32), k=1)
        mask = jnp.broadcast_to(causal, (B, S, S))

        bound = 1.0 / math.sqrt(D)
        wq = jax.random.uniform(k_wq, (D, D), jnp.float32, -bound, bound)
        bq = jax.random.uniform(k_bq, (D,), jnp.float32, -bound, bound)
        wo = jax.random.uniform(k_wo, (D, D), jnp.float32, -bound, bound)
        bo = jax.random.uniform(k_bo, (D,), jnp.float32, -bound, bound)

        out = multi_head_attention(querys, keys, values, mask, wq, bq, wo, bo, H,
                                   q_tile=q_tile, kv_tile=kv_tile)
        out = jax.block_until_ready(out)
        ref = _reference(querys, keys, values, mask, wq, bq, wo, bo, H)
        assert out.shape == (B, S, D)
        err = float(jnp.max(jnp.abs(out - ref)))
        # bf16 MXU operands + approx reciprocal vs f32 reference -> loosened tolerance.
        assert jnp.allclose(out, ref, atol=5e-2, rtol=5e-2), \
            f"mismatch vs reference (max abs err {err})"

    # Small canonical shapes implied by the module.
    run_case(B=2, S=8, D=32, H=4)
    # Larger sequence exercising multi-kv-tile online softmax + block skipping
    # (the (q-tile 0, kv-tile 1) block is fully masked under the causal mask).
    run_case(B=2, S=256, D=32, H=4, q_tile=128, kv_tile=128)

    print("KERNEL_OK")
</pallas_src>

<mosaic_0001>
module attributes {stable_mosaic.version = 11 : i64} {
  func.func @_linear_kernel(%arg0: i32, %arg1: memref<16x32xbf16, #tpu.memory_space<vmem>>, %arg2: memref<32x32xbf16, #tpu.memory_space<vmem>>, %arg3: memref<1x32xf32, #tpu.memory_space<vmem>>, %arg4: memref<16x32xbf16, #tpu.memory_space<vmem>>) attributes {dimension_semantics = [#tpu.dimension_semantics<parallel>], iteration_bounds = array<i64: 1>, scalar_prefetch = 0 : i64, scratch_operands = 0 : i64, tpu.core_type = #tpu.core_type<tc>, window_params = [{transform_indices = @transform_0, window_bounds = array<i64: 16, 32>}, {pipeline_mode = #tpu.pipeline_mode<synchronous>, transform_indices = @transform_1, window_bounds = array<i64: 32, 32>}, {pipeline_mode = #tpu.pipeline_mode<synchronous>, transform_indices = @transform_2, window_bounds = array<i64: 1, 32>}, {transform_indices = @transform_3, window_bounds = array<i64: 16, 32>}]} {
    %c0 = arith.constant 0 : index
    %c0_0 = arith.constant 0 : index
    %0 = vector.load %arg1[%c0, %c0_0] : memref<16x32xbf16, #tpu.memory_space<vmem>>, vector<16x32xbf16>
    %c0_1 = arith.constant 0 : index
    %c0_2 = arith.constant 0 : index
    %1 = vector.load %arg2[%c0_1, %c0_2] : memref<32x32xbf16, #tpu.memory_space<vmem>>, vector<32x32xbf16>
    %cst = arith.constant dense<0.000000e+00> : vector<16x32xf32>
    %2 = tpu.matmul %0, %1, %cst {dimension_numbers = #tpu.dot_dimension_numbers<[1], [0], [0], [1], [0, 0, 1, 1], [], []>} : vector<16x32xbf16>, vector<32x32xbf16>, vector<16x32xf32> -> vector<16x32xf32>
    %c0_3 = arith.constant 0 : index
    %c0_4 = arith.constant 0 : index
    %3 = vector.load %arg3[%c0_3, %c0_4] : memref<1x32xf32, #tpu.memory_space<vmem>>, vector<1x32xf32>
    %4 = vector.broadcast %3 : vector<1x32xf32> to vector<16x32xf32>
    %5 = arith.addf %2, %4 : vector<16x32xf32>
    %6 = arith.truncf %5 : vector<16x32xf32> to vector<16x32xbf16>
    %c0_5 = arith.constant 0 : index
    %c0_6 = arith.constant 0 : index
    %7 = vector.load %arg4[%c0_5, %c0_6] : memref<16x32xbf16, #tpu.memory_space<vmem>>, vector<16x32xbf16>
    tpu.vector_store %arg4[%c0_5, %c0_6], %6 {strides = array<i32>} : memref<16x32xbf16, #tpu.memory_space<vmem>>, vector<16x32xbf16>,
    return
  }
  func.func @transform_0(%arg0: i32) -> (i32, i32) {
    %c0_i32 = arith.constant 0 : i32
    %c0_i32_0 = arith.constant 0 : i32
    return %arg0, %c0_i32 : i32, i32
  }
  func.func @transform_1(%arg0: i32) -> (i32, i32) {
    %c0_i32 = arith.constant 0 : i32
    %c0_i32_0 = arith.constant 0 : i32
    %c0_i32_1 = arith.constant 0 : i32
    return %c0_i32, %c0_i32_0 : i32, i32
  }
  func.func @transform_2(%arg0: i32) -> (i32, i32) {
    %c0_i32 = arith.constant 0 : i32
    %c0_i32_0 = arith.constant 0 : i32
    %c0_i32_1 = arith.constant 0 : i32
    return %c0_i32, %c0_i32_0 : i32, i32
  }
  func.func @transform_3(%arg0: i32) -> (i32, i32) {
    %c0_i32 = arith.constant 0 : i32
    %c0_i32_0 = arith.constant 0 : i32
    return %arg0, %c0_i32 : i32, i32
  }
}

</mosaic_0001>

<bundles_post_ra>
// kernel: tpu_custom_call.1
= control target key start
LH: loop header
LB: loop body
LE: loop exit
PB: predicated region body
PF: predicated region fallthrough
CT: control target
= control target key end

     0   :  { %8 = vsyncpa [#allocation3], 0  ;;  %s325_s0 = inlined_call_operand.hbm [shape: bf16[16,32], index: 0, kind: input, shape index: {}]   ;;  %s326_s1 = inlined_call_operand.hbm [shape: bf16[32,32], index: 1, kind: input, shape index: {}]   ;;  %s327_s2 = inlined_call_operand.vmem [shape: f32[1,32], index: 2, kind: input, shape index: {}]   ;;  %s328_s3 = inlined_call_operand.hbm [shape: bf16[16,32], index: 3, kind: output, shape index: {}]  }
   0x1   :  { %9 = vsyncpa [#allocation6], 0 }
   0x2   :  { %10 = vsyncpa [#allocation4], 0  ;;  %s250_s12 = smov [#allocation2]   ;;  %s178_s16 = scalar_lea.hbm %s325_s0, 128 }
   0x3   :  { %s16_s13 = sshll.u32 %s250_s12, 4  ;;  %p179_p0 = scmp.ne.s32.totalorder %s325_s0, %s178_s16  ;;  %s17_s13 = int_to_ptr.vmem [resolvable:$true] %s16_s13 }
   0x4   :  { %p182_p1 = scmp.lt.u32.totalorder %s178_s16, %s325_s0 }
   0x6   :  { %p184_p2 = pnand %p182_p1, %p179_p0 }
   0x8   :  { %187 = shalt.err (!%p184_p2)
}
   0x9   :  { %s188_s21 = scalar_lea.vmem %s17_s13, 128  ;;  %p193_p4 = scmp.lt.s32.totalorder %s17_s13, %s17_s13 }
   0xa   :  { %p189_p3 = scmp.ne.s32.totalorder %s17_s13, %s188_s21  ;;  %p194_p5 = scmp.lt.s32.totalorder %s188_s21, %s188_s21 }
   0xc   :  { %p195_p6 = por %p194_p5, %p193_p4 }
   0xe   :  { %p196_p7 = pnand %p195_p6, %p189_p3 }
  0x10   :  { %199 = shalt.err (!%p196_p7)
}
  0x11   :  { %s251_s22 = smov 64   ;;  %s252_s23 = smov 4  }
  0x12   :  { %22 = dma.hbm_to_vmem [thread:$0]  %s325_s0, 128, %s17_s13, [#allocation3], %s251_s22, %s251_s22, %s252_s23  }
  0x13   :  { %s253_s26 = smov [#allocation5]   ;;  %s200_s30 = scalar_lea.hbm %s326_s1, 256 }
  0x14   :  { %s28_s27 = sshll.u32 %s253_s26, 4  ;;  %p201_p8 = scmp.ne.s32.totalorder %s326_s1, %s200_s30  ;;  %s29_s27 = int_to_ptr.vmem [resolvable:$true] %s28_s27 }
  0x15   :  { %p204_p9 = scmp.lt.u32.totalorder %s200_s30, %s326_s1 }
  0x17   :  { %p206_p10 = pnand %p204_p9, %p201_p8 }
  0x19   :  { %209 = shalt.err (!%p206_p10)
}
  0x1a   :  { %s210_s8 = scalar_lea.vmem %s29_s27, 256  ;;  %p215_p12 = scmp.lt.s32.totalorder %s29_s27, %s29_s27 }
  0x1b   :  { %p211_p11 = scmp.ne.s32.totalorder %s29_s27, %s210_s8  ;;  %p216_p13 = scmp.lt.s32.totalorder %s210_s8, %s210_s8 }
  0x1d   :  { %p217_p0 = por %p216_p13, %p215_p12 }
  0x1f   :  { %p218_p1 = pnand %p217_p0, %p211_p11 }
  0x21   :  { %221 = shalt.err (!%p218_p1)
}
  0x22   :  { %34 = dma.hbm_to_vmem [thread:$0]  %s326_s1, 256, %s29_s27, [#allocation6], %s251_s22, %s251_s22, %s252_s23  }
  0x23   :  { %244 = dma.done.wait [#allocation3], 128  }
  0x24   :  { %245 = vsyncadd [#allocation3], 4294967168 }
  0x25   :  { %246 = dma.done.wait [#allocation6], 256  }
  0x26   :  { %247 = vsyncadd [#allocation6], 4294967040  ;;  %v254_v0 = vmov 0.0   ;;  %vm255_vm0 = vmmov 0   ;;  %v175_v1 = vld [vmem:[#allocation5] sm:$0xff]   ;;  %v176_v2 = vld [vmem:[#allocation5 + $0x8] sm:$0xff]  }
  0x27   :  { %160 = vmatprep.subr.bf16.mxu0 %v254_v0  ;;  %164 = vmatprep.mubr.msk.bf16.mxu0 %vm255_vm0, %v254_v0  ;;  %v177_v3 = vld [vmem:[#allocation2] sm:$0xff]   ;;  %vm74_vm1 = vcmask 261120   ;;  %vm127_vm2 = vcmask 257024   ;;  %s256_s1 = smov [#allocation7]  }
  0x28   :  { %161 = vmatpush3.bf16.msra.mxu0 %v175_v1  ;;  %v148_v4 = vld [vmem:[%s327_s2] ss:$0 sm:$0xff]  ;;  %s135_s12 = sshll.u32 %s256_s1, 4  ;;  %s136_s12 = int_to_ptr.vmem [resolvable:$true] %s135_s12 }
  0x29   :  { %162 = vmatprep.subr.bf16.mxu0 %v254_v0  ;;  %s222_s13 = scalar_lea.vmem %s136_s12, 128  ;;  %p227_p3 = scmp.lt.s32.totalorder %s136_s12, %s136_s12 }
  0x2a   :  { %p223_p2 = scmp.ne.s32.totalorder %s136_s12, %s222_s13  ;;  %p228_p4 = scmp.lt.s32.totalorder %s222_s13, %s222_s13 }
  0x2c   :  { %163 = vmatpush3.bf16.msra.mxu0 %v176_v2  ;;  %p229_p5 = por %p228_p4, %p227_p3 }
  0x2e   :  { %p230_p6 = pnand %p229_p5, %p223_p2 }
  0x2f   :  { %165 = vmatmul.mubr.msk.bf16.vlgmr.msra.gmra.mrb[0].mxu0 %vm74_vm1, %v177_v3 }
 0x102   :  { %v112_v5 = vpop.f32.mrb[0].mxu0 }
 0x103   :  { %v113_v6 = vadd.f32 %v148_v4, %v112_v5  ;;  %v166_v7 = vpop.f32.mrb[1].mxu0 }
 0x104   :  { %v115_v8 = vpop.f32.mrb[2].mxu0 }
 0x105   :  { %v155_v9 = vpack.c.bf16 %v113_v6, %v113_v6  ;;  %v116_v10 = vadd.f32 %v148_v4, %v115_v8  ;;  %v167_v11 = vpop.f32.mrb[3].mxu0 }
 0x107   :  { %v156_v12 = vpack.c.bf16 %v116_v10, %v116_v10  ;;  %128 = vst.msk [vmem:[#allocation7] sm:$0xf] %vm127_vm2, %v155_v9 }
 0x109   :  { %129 = vst.msk [vmem:[#allocation7 + $0x4] sm:$0xf] %vm127_vm2, %v156_v12 }
 0x10a   :  { %233 = shalt.err (!%p230_p6)
}
 0x10b   :  { %s234_s15 = scalar_lea.hbm %s328_s3, 128 }
 0x10c   :  { %p235_p7 = scmp.ne.s32.totalorder %s328_s3, %s234_s15  ;;  %p238_p8 = scmp.lt.u32.totalorder %s234_s15, %s328_s3 }
 0x10e   :  { %p240_p9 = pnand %p238_p8, %p235_p7 }
 0x110   :  { %243 = shalt.err (!%p240_p9)
}
 0x111   :  { %141 = dma.vmem_to_hbm [thread:$0]  %s136_s12, 128, %s328_s3, [#allocation4], %s251_s22, %s251_s22, %s252_s23  }
 0x112   :  { %248 = dma.done.wait [#allocation4], 128  }
 0x113   :  { %249 = vsyncadd [#allocation4], 4294967168 }
 0x114   :  { %145 = vsyncpa [#allocation3], 1 }
 0x115   :  { %146 = vsyncpa [#allocation6], 1 }
 0x116   :  { %147 = vsyncpa [#allocation4], 1 }

</bundles_post_ra>
